<compile_context>
chip_gen: v7x
topology: tpu7x:2x2x1
jax: 0.10.0
libtpu: 0.0.40
codegen_flags: <defaults>
</compile_context>

<pallas_src>
import jax
import jax.numpy as jnp
from jax.experimental import pallas as pl
from jax.experimental.pallas import tpu as pltpu

_LANE = 128  # lane width of the fused weight and the packed output slab


def _vmem():
    # whole array resident in VMEM, single kernel invocation (no grid)
    return pl.BlockSpec(memory_space=pltpu.MemorySpace.VMEM)


# ----------------------------------------------------------------------------
# One fused kernel:
#   temb   = t * W_temp + b_temp                       (nn.Linear(1, E))
#   h      = tanh(temb @ mix)                          (stand-in for the LLM)
#   fused  = h @ [w_hist x S | w_type | w_time | 0...] (one MXU matmul)
#   lam    = softplus(dt*w_cur + b_cur + hist)
#   ev_ll  = log(sum(lam * onehot))
#   slam   = softplus(dt*(ratio (x) w_cur) + b_cur + hist_rep)  (B, L, S*T)
#   ll     = ev_ll - sum(slam)/S * dt
#   probs  = softmax(h @ w_type + b_type)              (EUP reciprocal)
#   times  = h @ w_time + b_time
#   packed output slab (B, L, 128): [probs | times | ll | zeros]
# ----------------------------------------------------------------------------
def tpp_llm_kernel(t_ref, wtemp_ref, btemp_ref, mix_ref,
                   dt_ref, oh_ref, wcat_ref, wcur_ref, bcur_ref,
                   btype_ref, btime_ref, wst_ref, bst_ref,
                   h_ref, out_ref):
    B, L, _ = t_ref.shape
    E = wtemp_ref.shape[-1]
    H = mix_ref.shape[-1]
    T = wcur_ref.shape[-1]
    ST = wst_ref.shape[-1]           # S * T
    S = ST // T
    inv_s = 1.0 / float(S)           # compile-time constant, no jnp.mean

    # ---- temporal embedding ('linear') + synthetic LLM hidden states -------
    temb = t_ref[...] * wtemp_ref[...] + btemp_ref[...]            # (B, L, E)
    # TODO(synk): the real model runs the HuggingFace AutoModel over interleaved
    # prompt/text/temporal token embeddings; this tanh-mix is a deterministic
    # stand-in for llm(...).last_hidden_state gathered at the event positions.
    h2d = jnp.tanh(jnp.dot(temb.reshape(B * L, E), mix_ref[...],
                           preferred_element_type=jnp.float32))    # (B*L, H)
    h_ref[...] = h2d.reshape(B, L, H)

    # ---- one fused MXU matmul feeds intensity_history / head_type / head_time
    # columns [0:ST]      = w_hist tiled per MC sample
    #         [ST:ST+T]   = w_type
    #         [ST+T]      = w_time
    #         rest        = zero padding to 128 lanes
    fused = jnp.dot(h2d, wcat_ref[...],
                    preferred_element_type=jnp.float32).reshape(B, L, _LANE)

    hist_rep = fused[:, :, 0:ST]                                   # (B, L, S*T)
    hist = fused[:, :, 0:T]                                        # (B, L, T)
    logits = fused[:, :, ST:ST + T] + btype_ref[...]               # (B, L, T)
    times = fused[:, :, ST + T:ST + T + 1] + btime_ref[...]        # (B, L, 1)

    dt = dt_ref[...]                                               # (B, L, 1), pre-shifted

    # intensities at observed deltas + event log-likelihood
    # (log can underflow to -inf for vanishing intensities; matches PyTorch)
    lam = jax.nn.softplus(dt * wcur_ref[...] + bcur_ref[...] + hist)
    ev_ll = jnp.log(jnp.sum(lam * oh_ref[...], axis=-1, keepdims=True))

    # Monte-Carlo non-event integral, lane-dense (B, L, S*T)
    slam = jax.nn.softplus(dt * wst_ref[...] + bst_ref[...] + hist_rep)
    non_ev = jnp.sum(slam, axis=-1, keepdims=True) * dt * inv_s

    ll = ev_ll - non_ev                                            # rows [0, L-2] valid

    # head_type softmax: divide on the EUP (+1 Newton step keeps validation tight)
    m = jnp.max(logits, axis=-1, keepdims=True)
    e = jnp.exp(logits - m)
    d = jnp.sum(e, axis=-1, keepdims=True)
    r = pl.reciprocal(d, approx=True)
    r = r * (2.0 - d * r)
    probs = e * r

    # single unmasked full-lane store of the packed (B, L, 128) slab
    pad = jnp.zeros((B, L, _LANE - (T + 2)), jnp.float32)
    out_ref[...] = jnp.concatenate([probs, times, ll, pad], axis=-1)


# ----------------------------------------------------------------------------
# Wrapper: pre-shift dt, pre-pad one-hot targets, build the fused/padded
# weights, run one pallas_call, unpack the output slab.
# ----------------------------------------------------------------------------
def tpp_llm_forward(event_times, event_time_deltas, event_types, params,
                    num_integral_samples):
    B, L = event_times.shape
    T = params["w_cur"].shape[-1]
    H = params["mix"].shape[-1]
    S = num_integral_samples
    assert S * T + T + 1 <= _LANE, "fused weight does not fit in 128 lanes"

    t3 = event_times[:, :, None].astype(jnp.float32)                # (B, L, 1)
    dt3 = event_time_deltas[:, :, None].astype(jnp.float32)         # (B, L, 1)

    # Pre-shift/pad so the kernel needs no (8,128)-misaligned row slices:
    # kernel row i uses dt[i+1], one_hot(type[i+1]) and hidden[i]; the padded
    # last row is a finite dummy that is sliced away after the call.
    dt_shift = jnp.concatenate(
        [dt3[:, 1:, :], jnp.ones((B, 1, 1), jnp.float32)], axis=1)
    onehot = jax.nn.one_hot(event_types[:, 1:], T, dtype=jnp.float32)
    oh_pad = jnp.concatenate(
        [onehot, jnp.ones((B, 1, T), jnp.float32)], axis=1)

    ratios = jnp.linspace(0.0, 1.0, S, dtype=jnp.float32)            # (S,)
    w_st = (ratios[:, None] * params["w_cur"]).reshape(1, S * T)     # ratio * w_cur
    b_st = jnp.tile(params["b_cur"], (1, S))                         # (1, S*T)

    w_cat = jnp.concatenate(
        [jnp.tile(params["w_hist"], (1, S)),   # hist replicated per MC sample
         params["w_type"], params["w_time"]], axis=-1)
    w_cat = jnp.pad(w_cat, ((0, 0), (0, _LANE - w_cat.shape[-1])))   # (H, 128)

    hidden, out = pl.pallas_call(
        tpp_llm_kernel,
        out_shape=(jax.ShapeDtypeStruct((B, L, H), jnp.float32),
                   jax.ShapeDtypeStruct((B, L, _LANE), jnp.float32)),
        in_specs=[_vmem()] * 13,
        out_specs=(_vmem(), _vmem()),
    )(t3, params["w_temp"], params["b_temp"], params["mix"],
      dt_shift, oh_pad, w_cat, params["w_cur"], params["b_cur"],
      params["b_type"], params["b_time"], w_st, b_st)

    probs = out[:, :, 0:T]          # next-event-type probabilities (B, L, T)
    times = out[:, :, T:T + 1]      # next-event times               (B, L, 1)
    ll = out[:, :L - 1, T + 1]      # interval log-likelihoods       (B, L-1)
    return hidden, ll, probs, times


# ----------------------------------------------------------------------------
# Pure-JAX reference (mirrors the PyTorch math) for validation.
# ----------------------------------------------------------------------------
def reference_heads(dt, onehot, hidden, params, S):
    dt1 = dt[:, 1:, :]
    h_prev = hidden[:, :-1, :]
    hist = jnp.einsum("blh,ht->blt", h_prev, params["w_hist"])
    cur = dt1 * params["w_cur"] + params["b_cur"]
    lam = jax.nn.softplus(cur + hist)
    ev_ll = jnp.log(jnp.sum(lam * onehot, axis=-1))
    ratios = jnp.linspace(0.0, 1.0, S, dtype=jnp.float32)
    sdt = dt1 * ratios[None, None, :]
    scur = sdt[..., None] * params["w_cur"][0] + params["b_cur"][0]
    slam = jax.nn.softplus(scur + hist[:, :, None, :])
    non_ev = jnp.mean(jnp.sum(slam, axis=-1), axis=-1) * dt1[..., 0]
    ll = ev_ll - non_ev
    logits = jnp.einsum("blh,ht->blt", hidden, params["w_type"]) + params["b_type"]
    probs = jax.nn.softmax(logits, axis=-1)
    times = jnp.einsum("blh,ho->blo", hidden, params["w_time"]) + params["b_time"]
    return ll, probs, times


# ----------------------------------------------------------------------------
if __name__ == "__main__":
    key = jax.random.PRNGKey(0)

    B, L, H, T, S = 2, 8, 32, 4, 5   # batch, seq_len, hidden, event types, MC samples
    E = H                             # embedding_dim == hidden_size

    ks = jax.random.split(key, 12)
    # event data
    event_times = jnp.cumsum(
        jnp.abs(jax.random.normal(ks[0], (B, L), jnp.float32)), axis=1)
    event_time_deltas = jnp.concatenate(
        [event_times[:, :1], jnp.diff(event_times, axis=1)], axis=1)     # (B, L)
    event_types = jax.random.randint(ks[1], (B, L), 0, T)

    # deterministic PyTorch-style uniform parameter init (weights transposed)
    def uni(k, shape, fan_in):
        bound = 1.0 / jnp.sqrt(float(fan_in))
        return jax.random.uniform(k, shape, jnp.float32, -bound, bound)

    params = {
        "w_cur":  uni(ks[2], (1, T), 1),    # intensity_current Linear(1, T)
        "b_cur":  uni(ks[3], (1, T), 1),
        "w_hist": uni(ks[4], (H, T), H),    # intensity_history Linear(H, T, bias=False)
        "w_type": uni(ks[5], (H, T), H),    # head_type Linear(H, T)
        "b_type": uni(ks[6], (1, T), H),
        "w_time": uni(ks[7], (H, 1), H),    # head_time Linear(H, 1)
        "b_time": uni(ks[8], (1, 1), H),
        "w_temp": uni(ks[9], (1, E), 1),    # temporal_embedder ('linear')
        "b_temp": uni(ks[10], (1, E), 1),
        "mix":    uni(ks[11], (E, H), E),   # synthetic LLM stand-in weight
    }

    # ---- fused forward(): embeddings + stand-in LLM + all TPP heads (Pallas)
    hidden, ll, probs, times = tpp_llm_forward(
        event_times, event_time_deltas, event_types, params, S)
    jax.block_until_ready((hidden, ll, probs, times))

    # ---- validate against pure-JAX references --------------------------------
    temb_ref = event_times[:, :, None] * params["w_temp"] + params["b_temp"]
    hidden_ref = jnp.tanh(jnp.einsum("ble,eh->blh", temb_ref, params["mix"]))

    dt3 = event_time_deltas[:, :, None]
    onehot = jax.nn.one_hot(event_types[:, 1:], T, dtype=jnp.float32)
    ll_r, probs_r, times_r = reference_heads(dt3, onehot, hidden, params, S)

    assert jnp.allclose(hidden, hidden_ref, rtol=2e-3, atol=2e-3)
    assert jnp.allclose(ll, ll_r, rtol=1e-3, atol=1e-3)
    assert jnp.allclose(probs, probs_r, rtol=1e-3, atol=1e-3)
    assert jnp.allclose(times, times_r, rtol=1e-3, atol=1e-3)

    print("KERNEL_OK")
</pallas_src>

<mosaic_0001>
module attributes {stable_mosaic.version = 11 : i64} {
  func.func @tpp_llm_kernel(%arg0: memref<2x8x1xf32, #tpu.memory_space<vmem>>, %arg1: memref<1x32xf32, #tpu.memory_space<vmem>>, %arg2: memref<1x32xf32, #tpu.memory_space<vmem>>, %arg3: memref<32x32xf32, #tpu.memory_space<vmem>>, %arg4: memref<2x8x1xf32, #tpu.memory_space<vmem>>, %arg5: memref<2x8x4xf32, #tpu.memory_space<vmem>>, %arg6: memref<32x128xf32, #tpu.memory_space<vmem>>, %arg7: memref<1x4xf32, #tpu.memory_space<vmem>>, %arg8: memref<1x4xf32, #tpu.memory_space<vmem>>, %arg9: memref<1x4xf32, #tpu.memory_space<vmem>>, %arg10: memref<1x1xf32, #tpu.memory_space<vmem>>, %arg11: memref<1x20xf32, #tpu.memory_space<vmem>>, %arg12: memref<1x20xf32, #tpu.memory_space<vmem>>, %arg13: memref<2x8x32xf32, #tpu.memory_space<vmem>>, %arg14: memref<2x8x128xf32, #tpu.memory_space<vmem>>) attributes {dimension_semantics = [], scalar_prefetch = 0 : i64, scratch_operands = 0 : i64, tpu.core_type = #tpu.core_type<tc>} {
    %c0 = arith.constant 0 : index
    %c0_0 = arith.constant 0 : index
    %c0_1 = arith.constant 0 : index
    %0 = vector.load %arg0[%c0, %c0_0, %c0_1] : memref<2x8x1xf32, #tpu.memory_space<vmem>>, vector<2x8x1xf32>
    %c0_2 = arith.constant 0 : index
    %c0_3 = arith.constant 0 : index
    %1 = vector.load %arg1[%c0_2, %c0_3] : memref<1x32xf32, #tpu.memory_space<vmem>>, vector<1x32xf32>
    %2 = vector.shape_cast %1 : vector<1x32xf32> to vector<1x1x32xf32>
    %3 = vector.broadcast %0 : vector<2x8x1xf32> to vector<2x8x32xf32>
    %4 = vector.broadcast %2 : vector<1x1x32xf32> to vector<2x8x32xf32>
    %5 = arith.mulf %3, %4 : vector<2x8x32xf32>
    %c0_4 = arith.constant 0 : index
    %c0_5 = arith.constant 0 : index
    %6 = vector.load %arg2[%c0_4, %c0_5] : memref<1x32xf32, #tpu.memory_space<vmem>>, vector<1x32xf32>
    %7 = vector.shape_cast %6 : vector<1x32xf32> to vector<1x1x32xf32>
    %8 = vector.broadcast %7 : vector<1x1x32xf32> to vector<2x8x32xf32>
    %9 = arith.addf %5, %8 : vector<2x8x32xf32>
    %10 = vector.shape_cast %9 : vector<2x8x32xf32> to vector<16x32xf32>
    %c0_6 = arith.constant 0 : index
    %c0_7 = arith.constant 0 : index
    %11 = vector.load %arg3[%c0_6, %c0_7] : memref<32x32xf32, #tpu.memory_space<vmem>>, vector<32x32xf32>
    %cst = arith.constant dense<0.000000e+00> : vector<16x32xf32>
    %12 = tpu.matmul %10, %11, %cst {dimension_numbers = #tpu.dot_dimension_numbers<[1], [0], [0], [1], [0, 0, 1, 1], [], []>} : vector<16x32xf32>, vector<32x32xf32>, vector<16x32xf32> -> vector<16x32xf32>
    %13 = math.tanh %12 : vector<16x32xf32>
    %14 = vector.shape_cast %13 : vector<16x32xf32> to vector<2x8x32xf32>
    %c0_8 = arith.constant 0 : index
    %c0_9 = arith.constant 0 : index
    %c0_10 = arith.constant 0 : index
    %15 = vector.load %arg13[%c0_8, %c0_9, %c0_10] : memref<2x8x32xf32, #tpu.memory_space<vmem>>, vector<2x8x32xf32>
    tpu.vector_store %arg13[%c0_8, %c0_9, %c0_10], %14 {strides = array<i32>} : memref<2x8x32xf32, #tpu.memory_space<vmem>>, vector<2x8x32xf32>,
    %c0_11 = arith.constant 0 : index
    %c0_12 = arith.constant 0 : index
    %16 = vector.load %arg6[%c0_11, %c0_12] : memref<32x128xf32, #tpu.memory_space<vmem>>, vector<32x128xf32>
    %cst_13 = arith.constant dense<0.000000e+00> : vector<16x128xf32>
    %17 = tpu.matmul %13, %16, %cst_13 {dimension_numbers = #tpu.dot_dimension_numbers<[1], [0], [0], [1], [0, 0, 1, 1], [], []>} : vector<16x32xf32>, vector<32x128xf32>, vector<16x128xf32> -> vector<16x128xf32>
    %18 = vector.shape_cast %17 : vector<16x128xf32> to vector<2x8x128xf32>
    %19 = vector.extract_strided_slice %18 {offsets = [0, 0, 0], sizes = [2, 8, 20], strides = [1, 1, 1]} : vector<2x8x128xf32> to vector<2x8x20xf32>
    %20 = vector.extract_strided_slice %18 {offsets = [0, 0, 0], sizes = [2, 8, 4], strides = [1, 1, 1]} : vector<2x8x128xf32> to vector<2x8x4xf32>
    %21 = vector.extract_strided_slice %18 {offsets = [0, 0, 20], sizes = [2, 8, 4], strides = [1, 1, 1]} : vector<2x8x128xf32> to vector<2x8x4xf32>
    %c0_14 = arith.constant 0 : index
    %c0_15 = arith.constant 0 : index
    %22 = vector.load %arg9[%c0_14, %c0_15] : memref<1x4xf32, #tpu.memory_space<vmem>>, vector<1x4xf32>
    %23 = vector.shape_cast %22 : vector<1x4xf32> to vector<1x1x4xf32>
    %24 = vector.broadcast %23 : vector<1x1x4xf32> to vector<2x8x4xf32>
    %25 = arith.addf %21, %24 : vector<2x8x4xf32>
    %26 = vector.extract_strided_slice %18 {offsets = [0, 0, 24], sizes = [2, 8, 1], strides = [1, 1, 1]} : vector<2x8x128xf32> to vector<2x8x1xf32>
    %c0_16 = arith.constant 0 : index
    %c0_17 = arith.constant 0 : index
    %27 = vector.load %arg10[%c0_16, %c0_17] : memref<1x1xf32, #tpu.memory_space<vmem>>, vector<1x1xf32>
    %28 = vector.shape_cast %27 : vector<1x1xf32> to vector<1x1x1xf32>
    %29 = vector.broadcast %28 : vector<1x1x1xf32> to vector<2x8x1xf32>
    %30 = arith.addf %26, %29 : vector<2x8x1xf32>
    %c0_18 = arith.constant 0 : index
    %c0_19 = arith.constant 0 : index
    %c0_20 = arith.constant 0 : index
    %31 = vector.load %arg4[%c0_18, %c0_19, %c0_20] : memref<2x8x1xf32, #tpu.memory_space<vmem>>, vector<2x8x1xf32>
    %c0_21 = arith.constant 0 : index
    %c0_22 = arith.constant 0 : index
    %32 = vector.load %arg7[%c0_21, %c0_22] : memref<1x4xf32, #tpu.memory_space<vmem>>, vector<1x4xf32>
    %33 = vector.shape_cast %32 : vector<1x4xf32> to vector<1x1x4xf32>
    %34 = vector.broadcast %31 : vector<2x8x1xf32> to vector<2x8x4xf32>
    %35 = vector.broadcast %33 : vector<1x1x4xf32> to vector<2x8x4xf32>
    %36 = arith.mulf %34, %35 : vector<2x8x4xf32>
    %c0_23 = arith.constant 0 : index
    %c0_24 = arith.constant 0 : index
    %37 = vector.load %arg8[%c0_23, %c0_24] : memref<1x4xf32, #tpu.memory_space<vmem>>, vector<1x4xf32>
    %38 = vector.shape_cast %37 : vector<1x4xf32> to vector<1x1x4xf32>
    %39 = vector.broadcast %38 : vector<1x1x4xf32> to vector<2x8x4xf32>
    %40 = arith.addf %36, %39 : vector<2x8x4xf32>
    %41 = arith.addf %40, %20 : vector<2x8x4xf32>
    %cst_25 = arith.constant 0.000000e+00 : f32
    %42 = vector.broadcast %cst_25 : f32 to vector<2x8x4xf32>
    %43 = arith.maximumf %41, %42 : vector<2x8x4xf32>
    %44 = vector.broadcast %cst_25 : f32 to vector<2x8x4xf32>
    %45 = arith.subf %41, %44 : vector<2x8x4xf32>
    %46 = arith.cmpf one, %45, %45 : vector<2x8x4xf32>
    %47 = vector.broadcast %cst_25 : f32 to vector<2x8x4xf32>
    %48 = arith.addf %41, %47 : vector<2x8x4xf32>
    %49 = math.absf %45 : vector<2x8x4xf32>
    %cst_26 = arith.constant 0.000000e+00 : f32
    %50 = vector.broadcast %cst_26 : f32 to vector<2x8x4xf32>
    %51 = arith.subf %50, %49 : vector<2x8x4xf32>
    %52 = math.exp %51 : vector<2x8x4xf32>
    %53 = math.log1p %52 : vector<2x8x4xf32>
    %54 = arith.addf %43, %53 : vector<2x8x4xf32>
    %55 = arith.select %46, %48, %54 : vector<2x8x4xi1>, vector<2x8x4xf32>
    %c0_27 = arith.constant 0 : index
    %c0_28 = arith.constant 0 : index
    %c0_29 = arith.constant 0 : index
    %56 = vector.load %arg5[%c0_27, %c0_28, %c0_29] : memref<2x8x4xf32, #tpu.memory_space<vmem>>, vector<2x8x4xf32>
    %57 = arith.mulf %55, %56 : vector<2x8x4xf32>
    %cst_30 = arith.constant dense<0.000000e+00> : vector<2x8xf32>
    %58 = vector.multi_reduction <add>, %57, %cst_30 [2] : vector<2x8x4xf32> to vector<2x8xf32>
    %59 = vector.shape_cast %58 : vector<2x8xf32> to vector<2x8x1xf32>
    %60 = math.log %59 : vector<2x8x1xf32>
    %c0_31 = arith.constant 0 : index
    %c0_32 = arith.constant 0 : index
    %61 = vector.load %arg11[%c0_31, %c0_32] : memref<1x20xf32, #tpu.memory_space<vmem>>, vector<1x20xf32>
    %62 = vector.shape_cast %61 : vector<1x20xf32> to vector<1x1x20xf32>
    %63 = vector.broadcast %31 : vector<2x8x1xf32> to vector<2x8x20xf32>
    %64 = vector.broadcast %62 : vector<1x1x20xf32> to vector<2x8x20xf32>
    %65 = arith.mulf %63, %64 : vector<2x8x20xf32>
    %c0_33 = arith.constant 0 : index
    %c0_34 = arith.constant 0 : index
    %66 = vector.load %arg12[%c0_33, %c0_34] : memref<1x20xf32, #tpu.memory_space<vmem>>, vector<1x20xf32>
    %67 = vector.shape_cast %66 : vector<1x20xf32> to vector<1x1x20xf32>
    %68 = vector.broadcast %67 : vector<1x1x20xf32> to vector<2x8x20xf32>
    %69 = arith.addf %65, %68 : vector<2x8x20xf32>
    %70 = arith.addf %69, %19 : vector<2x8x20xf32>
    %cst_35 = arith.constant 0.000000e+00 : f32
    %71 = vector.broadcast %cst_35 : f32 to vector<2x8x20xf32>
    %72 = arith.maximumf %70, %71 : vector<2x8x20xf32>
    %73 = vector.broadcast %cst_35 : f32 to vector<2x8x20xf32>
    %74 = arith.subf %70, %73 : vector<2x8x20xf32>
    %75 = arith.cmpf one, %74, %74 : vector<2x8x20xf32>
    %76 = vector.broadcast %cst_35 : f32 to vector<2x8x20xf32>
    %77 = arith.addf %70, %76 : vector<2x8x20xf32>
    %78 = math.absf %74 : vector<2x8x20xf32>
    %cst_36 = arith.constant 0.000000e+00 : f32
    %79 = vector.broadcast %cst_36 : f32 to vector<2x8x20xf32>
    %80 = arith.subf %79, %78 : vector<2x8x20xf32>
    %81 = math.exp %80 : vector<2x8x20xf32>
    %82 = math.log1p %81 : vector<2x8x20xf32>
    %83 = arith.addf %72, %82 : vector<2x8x20xf32>
    %84 = arith.select %75, %77, %83 : vector<2x8x20xi1>, vector<2x8x20xf32>
    %cst_37 = arith.constant dense<0.000000e+00> : vector<2x8xf32>
    %85 = vector.multi_reduction <add>, %84, %cst_37 [2] : vector<2x8x20xf32> to vector<2x8xf32>
    %86 = vector.shape_cast %85 : vector<2x8xf32> to vector<2x8x1xf32>
    %87 = arith.mulf %86, %31 : vector<2x8x1xf32>
    %cst_38 = arith.constant 2.000000e-01 : f32
    %88 = vector.broadcast %cst_38 : f32 to vector<2x8x1xf32>
    %89 = arith.mulf %87, %88 : vector<2x8x1xf32>
    %90 = arith.subf %60, %89 : vector<2x8x1xf32>
    %cst_39 = arith.constant dense<0xFF800000> : vector<2x8xf32>
    %91 = vector.multi_reduction <maximumf>, %25, %cst_39 [2] : vector<2x8x4xf32> to vector<2x8xf32>
    %92 = vector.shape_cast %91 : vector<2x8xf32> to vector<2x8x1xf32>
    %93 = vector.broadcast %92 : vector<2x8x1xf32> to vector<2x8x4xf32>
    %94 = arith.subf %25, %93 : vector<2x8x4xf32>
    %95 = math.exp %94 : vector<2x8x4xf32>
    %cst_40 = arith.constant dense<0.000000e+00> : vector<2x8xf32>
    %96 = vector.multi_reduction <add>, %95, %cst_40 [2] : vector<2x8x4xf32> to vector<2x8xf32>
    %97 = vector.shape_cast %96 : vector<2x8xf32> to vector<2x8x1xf32>
    %98 = tpu.reciprocal %97 {approx = true} : vector<2x8x1xf32> -> vector<2x8x1xf32>
    %99 = arith.mulf %97, %98 : vector<2x8x1xf32>
    %cst_41 = arith.constant 2.000000e+00 : f32
    %100 = vector.broadcast %cst_41 : f32 to vector<2x8x1xf32>
    %101 = arith.subf %100, %99 : vector<2x8x1xf32>
    %102 = arith.mulf %98, %101 : vector<2x8x1xf32>
    %103 = vector.broadcast %102 : vector<2x8x1xf32> to vector<2x8x4xf32>
    %104 = arith.mulf %95, %103 : vector<2x8x4xf32>
    %cst_42 = arith.constant 0.000000e+00 : f32
    %105 = vector.broadcast %cst_42 : f32 to vector<2x8x122xf32>
    %106 = tpu.concatenate %104, %30, %90, %105 in 2 : vector<2x8x4xf32>, vector<2x8x1xf32>, vector<2x8x1xf32>, vector<2x8x122xf32> -> vector<2x8x128xf32>
    %c0_43 = arith.constant 0 : index
    %c0_44 = arith.constant 0 : index
    %c0_45 = arith.constant 0 : index
    %107 = vector.load %arg14[%c0_43, %c0_44, %c0_45] : memref<2x8x128xf32, #tpu.memory_space<vmem>>, vector<2x8x128xf32>
    tpu.vector_store %arg14[%c0_43, %c0_44, %c0_45], %106 {strides = array<i32>} : memref<2x8x128xf32, #tpu.memory_space<vmem>>, vector<2x8x128xf32>,
    return
  }
}

</mosaic_0001>

<bundles_post_ra>
// kernel: tpu_custom_call.1
= control target key start
LH: loop header
LB: loop body
LE: loop exit
PB: predicated region body
PF: predicated region fallthrough
CT: control target
= control target key end

     0   :  { %s993_s0 = inlined_call_operand.vmem [shape: f32[2,8,1], index: 0, kind: input, shape index: {}]   ;;  %s994_s1 = inlined_call_operand.vmem [shape: f32[1,32], index: 1, kind: input, shape index: {}]   ;;  %s995_s2 = inlined_call_operand.hbm [shape: f32[1,32], index: 2, kind: input, shape index: {}]   ;;  %s996_s3 = inlined_call_operand.vmem [shape: f32[32,32], index: 3, kind: input, shape index: {}]   ;;  %s997_s4 = inlined_call_operand.vmem [shape: f32[2,8,1], index: 4, kind: input, shape index: {}]   ;;  %s998_s5 = inlined_call_operand.vmem [shape: f32[2,8,4], index: 5, kind: input, shape index: {}]   ;;  %s999_s6 = inlined_call_operand.vmem [shape: f32[32,128], index: 6, kind: input, shape index: {}]   ;;  %s1000_s7 = inlined_call_operand.vmem [shape: f32[1,4], index: 7, kind: input, shape index: {}]   ;;  %s1001_s8 = inlined_call_operand.vmem [shape: f32[1,4], index: 8, kind: input, shape index: {}]   ;;  %s1002_s9 = inlined_call_operand.vmem [shape: f32[1,4], index: 9, kind: input, shape index: {}]   ;;  %s1003_s10 = inlined_call_operand.<no memory space> [shape: f32[1,1], index: 10, kind: input, shape index: {}]   ;;  %s1004_s11 = inlined_call_operand.vmem [shape: f32[1,20], index: 11, kind: input, shape index: {}]   ;;  %s1005_s12 = inlined_call_operand.vmem [shape: f32[1,20], index: 12, kind: input, shape index: {}]   ;;  %s1006_s13 = inlined_call_operand.hbm [shape: f32[2,8,32], index: 13, kind: output, shape index: {0}]   ;;  %s1007_s14 = inlined_call_operand.hbm [shape: f32[2,8,128], index: 14, kind: output, shape index: {1}]  }
   0x1   :  { %v20_v0 = vstv %s1003_s10 }
   0x2   :  { %21 = vst [vmem:[#allocation2] sm:$0x1] %v20_v0 }
   0x3   :  { %22 = vsyncpa [#allocation4], 0 }
   0x4   :  { %23 = vsyncpa [#allocation5], 0 }
   0x5   :  { %24 = vsyncpa [#allocation8], 0  ;;  %s723_s15 = smov [#allocation3]   ;;  %s651_s19 = scalar_lea.hbm %s995_s2, 16 }
   0x6   :  { %s35_s16 = sshll.u32 %s723_s15, 4  ;;  %p652_p0 = scmp.ne.s32.totalorder %s995_s2, %s651_s19  ;;  %s36_s16 = int_to_ptr.vmem [resolvable:$true] %s35_s16 }
   0x7   :  { %p655_p1 = scmp.lt.u32.totalorder %s651_s19, %s995_s2 }
   0x9   :  { %p657_p2 = pnand %p655_p1, %p652_p0 }
   0xb   :  { %660 = shalt.err (!%p657_p2)
}
   0xc   :  { %s661_s10 = scalar_lea.vmem %s36_s16, 16  ;;  %s665_s24 = scalar_lea.vmem %s36_s16, 32 }
   0xd   :  { %p662_p3 = scmp.ne.s32.totalorder %s36_s16, %s661_s10  ;;  %p666_p4 = scmp.lt.s32.totalorder %s36_s16, %s36_s16 }
   0xe   :  { %p667_p5 = scmp.lt.s32.totalorder %s665_s24, %s661_s10 }
  0x10   :  { %p668_p6 = por %p667_p5, %p666_p4 }
  0x12   :  { %p669_p7 = pnand %p668_p6, %p662_p3 }
  0x14   :  { %672 = shalt.err (!%p669_p7)
}
  0x15   :  { %38 = dma.hbm_to_vmem [thread:$0]  %s995_s2, 16, %s36_s16, [#allocation4]  }
  0x16   :  { %717 = dma.done.wait [#allocation4], 16  }
  0x17   :  { %718 = vsyncadd [#allocation4], 4294967280  ;;  %v724_v1 = vmov 0   ;;  %v62_v2 = vld [vmem:[%s993_s0] sm:$0xff]  ;;  %v93_v4 = vld [vmem:[%s996_s3 + $0x8] sm:$0xff]  ;;  %vm96_vm0 = vcmask 261120  }
  0x18   :  { %617 = vset.pattern.permute.xlu0 %v724_v1  ;;  %618 = vset.pattern.permute.xlu1 %v724_v1  ;;  %v92_v3 = vld [vmem:[%s996_s3] sm:$0xff]  ;;  %v63_v5 = vld [vmem:[%s993_s0 + $0x8] sm:$0xff]  ;;  %v94_v7 = vld [vmem:[%s996_s3 + $0x10] sm:$0xff]  ;;  %s725_s30 = smov 20   ;;  %vm441_vm1 = vcmask 195744   ;;  %s726_s18 = smov 108  }
  0x19   :  { %67 = vperm.xlu0 %617, %v62_v2   ;;  %v591_v6 = vpack.c.bf16 %v93_v4, %v92_v3  ;;  %v95_v8 = vld [vmem:[%s996_s3 + $0x18] sm:$0xff]  ;;  %v545_v10 = vld [vmem:[%s994_s1] ss:$0 sm:$0xff]  ;;  %v546_v12 = vld [vmem:[#allocation3] ss:$0 sm:$0xff]  ;;  %vm361_vm8 = vcmask 31744  }
  0x1a   :  { %v595_v9 = vpack.c.bf16 %v95_v8, %v94_v7  ;;  %v182_v18 = vld [vmem:[%s999_s6] sm:$0xff]  ;;  %v183_v19 = vld [vmem:[%s999_s6 + $0x8] sm:$0xff]  ;;  %v184_v21 = vld [vmem:[%s999_s6 + $0x10] sm:$0xff]  ;;  %vm428_vm11 = vcmask 162816   ;;  %s728_s0 = smov [#allocation6]   ;;  %s729_s10 = smov 5  }
  0x1b   :  { %592 = vmatprep.subr.bf16.mxu0 %v591_v6  ;;  %v599_v20 = vpack.c.bf16 %v183_v19, %v182_v18  ;;  %v185_v22 = vld [vmem:[%s999_s6 + $0x18] sm:$0xff]  ;;  %v551_v24 = vld [vmem:[%s1002_s9] ss:$0 sm:$0xff]  ;;  %v874_v36 = vld [vmem:[%s997_s4 + $0x8] sm:$0xff]  ;;  %s517_s3 = sshll.u32 %s728_s0, 4  ;;  %s518_s3 = int_to_ptr.vmem [resolvable:$true] %s517_s3 }
  0x1c   :  { %594 = vmatpush3.bf16.msra.mxu0 %v591_v6  ;;  %v603_v23 = vpack.c.bf16 %v185_v22, %v184_v21  ;;  %273 = vrot.lane.b32.xlu1 %v551_v24, %s725_s30  ;;  %v880_v37 = vld [vmem:[%s997_s4] sm:$0xff]  ;;  %s673_s24 = scalar_lea.vmem %s518_s3, 256  ;;  %p678_p9 = scmp.lt.s32.totalorder %s518_s3, %s518_s3 }
  0x1d   :  { %72 = vperm.xlu0 %617, %v63_v5   ;;  %596 = vmatprep.subr.bf16.mxu0 %v595_v9  ;;  %v553_v47 = vld [vmem:[%s1000_s7] ss:$0 sm:$0xff]  ;;  %p674_p8 = scmp.ne.s32.totalorder %s518_s3, %s673_s24  ;;  %p679_p10 = scmp.lt.s32.totalorder %s673_s24, %s673_s24 }
  0x1e   :  { %600 = vmatprep.subr.bf16.mxu1 %v599_v20  ;;  %v554_v51 = vld [vmem:[%s1001_s8] ss:$0 sm:$0xff] }
  0x1f   :  { %602 = vmatpush3.bf16.msra.mxu1 %v599_v20  ;;  %v555_v54 = vld [vmem:[%s1004_s11] ss:$0 sm:$0xff]  ;;  %p680_p11 = por %p679_p10, %p678_p9 }
  0x20   :  { %598 = vmatpush3.bf16.msra.mxu0 %v595_v9  ;;  %604 = vmatprep.subr.bf16.mxu1 %v603_v23  ;;  %v556_v59 = vld [vmem:[%s1005_s12] ss:$0 sm:$0xff] }
  0x21   :  { %p681_p12 = pnand %p680_p11, %p674_p8 }
  0x23   :  { %606 = vmatpush3.bf16.msra.mxu1 %v603_v23 }
  0x8e   :  { %v274_v29 = vpop.permute.xlu1 %273 }
  0x98   :  { %v68_v11 = vpop.permute.xlu0 %67 }
  0x99   :  { %v81_v13 = vmul.f32 %v545_v10, %v68_v11 }
  0x9b   :  { %v90_v14 = vadd.f32 %v546_v12, %v81_v13 }
  0x9c   :  { %v73_v15 = vpop.permute.xlu0 %72 }
  0x9d   :  { %v82_v16 = vmul.f32 %v545_v10, %v73_v15  ;;  %577 = vmatprep.mubr.msk.f32.mxu0 %vm96_vm0, %v90_v14 }
  0x9f   :  { %v91_v17 = vadd.f32 %v546_v12, %v82_v16 }
  0xa1   :  { %578 = vmatmul.mubr.msk.f32.vlgmr.msra.gmra.mrb[0].mxu0 %vm96_vm0, %v91_v17 }
 0x174   :  { %v579_v25 = vpop.f32.mrb[0].mxu0 }
 0x175   :  { %619 = vtanh.f32 %v579_v25  ;;  %v169_v26 = vpop.f32.mrb[1].mxu0 }
 0x176   :  { %621 = vtanh.f32 %v169_v26 }
 0x17f   :  { %v620_v27 = vpop.eup %619 }
 0x180   :  { %v622_v28 = vpop.eup %621  ;;  %181 = vst.msk [vmem:[#allocation6 + $0x8] sm:$0xff] %vm96_vm0, %v620_v27 }
 0x181   :  { %180 = vst.msk [vmem:[#allocation6] sm:$0xff] %vm96_vm0, %v622_v28  ;;  %588 = vmatprep.mubr.msk.f32.mxu1 %vm96_vm0, %v622_v28 }
 0x182   :  { %589 = vmatmul.mubr.msk.f32.vlgmr.msra.gmra.mrb[0].mxu1 %vm96_vm0, %v620_v27 }
 0x255   :  { %v865_v30 = vpop.f32.mrb[0].mxu1 }
 0x256   :  { %v867_v31 = vpop.f32.mrb[1].mxu1  ;;  %v277_v32 = vadd.f32 %v865_v30, %v274_v29 }
 0x257   :  { %v276_v33 = vadd.f32 %v274_v29, %v867_v31 }
 0x258   :  { %v445_v34 = vsel %vm441_vm1, %v277_v32, -inf }
 0x259   :  { %446 = vmax.xlane.f32.xlu0 %v445_v34  ;;  %v442_v35 = vsel %vm441_vm1, %v276_v33, -inf }
 0x25a   :  { %443 = vmax.xlane.f32.xlu1 %v442_v35 }
 0x26b   :  { %299 = vperm.xlu1 %618, %v874_v36  }
 0x26f   :  { %294 = vperm.xlu0 %617, %v880_v37  }
 0x2e6   :  { %v447_v38 = vpop.xlane.xlu0 %446 }
 0x2e7   :  { %v449_v39 = vsub.f32 %v277_v32, %v447_v38  ;;  %v444_v40 = vpop.xlane.xlu1 %443 }
 0x2e8   :  { %v448_v41 = vsub.f32 %v276_v33, %v444_v40 }
 0x2e9   :  { %v452_v42 = vmul.f32 1.442695, %v449_v39 }
 0x2ea   :  { %v450_v43 = vmul.f32 1.442695, %v448_v41 }
 0x2eb   :  { %623 = vpow2.f32 %v452_v42  ;;  %v300_v48 = vpop.permute.xlu1 %299 }
 0x2ec   :  { %625 = vpow2.f32 %v450_v43  ;;  %v309_v50 = vmul.f32 %v553_v47, %v300_v48  ;;  %v380_v58 = vmul.f32 %v555_v54, %v300_v48 }
 0x2ee   :  { %v295_v46 = vpop.permute.xlu0 %294  ;;  %v318_v53 = vadd.f32 %v554_v51, %v309_v50  ;;  %v389_v63 = vadd.f32 %v556_v59, %v380_v58  ;;  %v357_v58 = vld [vmem:[%s998_s5] sm:$0xff] }
 0x2ef   :  { %v308_v49 = vmul.f32 %v553_v47, %v295_v46  ;;  %v379_v56 = vmul.f32 %v555_v54, %v295_v46 }
 0x2f0   :  { %v904_v57 = vadd.f32 %v865_v30, %v318_v53  ;;  %v915_v3 = vadd.f32 %v865_v30, %v389_v63 }
 0x2f1   :  { %v317_v52 = vadd.f32 %v554_v51, %v308_v49  ;;  %v388_v61 = vadd.f32 %v556_v59, %v379_v56 }
 0x2f2   :  { %v328_v62 = vand.u32 2147483647, %v904_v57  ;;  %v399_v7 = vand.u32 2147483647, %v915_v3  ;;  %v322_v43 = vmax.f32 %v904_v57, 0.0  ;;  %vm324_vm5 = vcmp.ne.f32.partialorder %v904_v57, %v904_v57 }
 0x2f3   :  { %v901_v55 = vadd.f32 %v317_v52, %v867_v31  ;;  %v912_v1 = vadd.f32 %v388_v61, %v867_v31  ;;  %vm395_vm10 = vcmp.ne.f32.partialorder %v915_v3, %v915_v3 }
 0x2f4   :  { %v330_v2 = vsub.f32 0.0, %v328_v62  ;;  %v401_v9 = vsub.f32 0.0, %v399_v7  ;;  %v358_v62 = vld [vmem:[%s998_s5 + $0x8] sm:$0xff]  ;;  %v393_v7 = vmax.f32 %v915_v3, 0.0  ;;  %s727_s5 = smov 24  }
 0x2f5   :  { %v883_v44 = vpop.eup %623  ;;  %v327_v60 = vand.u32 2147483647, %v901_v55  ;;  %v398_v5 = vand.u32 2147483647, %v912_v1  ;;  %v321_v40 = vmax.f32 %v901_v55, 0.0  ;;  %vm323_vm4 = vcmp.ne.f32.partialorder %v901_v55, %v901_v55 }
 0x2f6   :  { %v885_v45 = vpop.eup %625  ;;  %458 = vrot.lane.b32.xlu0 %v883_v44, %s726_s18  ;;  %v333_v6 = vmul.f32 1.442695, %v330_v2  ;;  %v404_v11 = vmul.f32 1.442695, %v401_v9  ;;  %vm394_vm9 = vcmp.ne.f32.partialorder %v912_v1, %v912_v1 }
 0x2f7   :  { %456 = vrot.lane.b32.xlu1 %v885_v45, %s726_s18  ;;  %v329_v0 = vsub.f32 0.0, %v327_v60  ;;  %v400_v8 = vsub.f32 0.0, %v398_v5 }
 0x2f9   :  { %v331_v4 = vmul.f32 1.442695, %v329_v0  ;;  %v402_v10 = vmul.f32 1.442695, %v400_v8  ;;  %v392_v0 = vmax.f32 %v912_v1, 0.0 }
 0x2fb   :  { %627 = vpow2.f32 %v331_v4 }
 0x2fc   :  { %629 = vpow2.f32 %v333_v6 }
 0x2fd   :  { %631 = vpow2.f32 %v402_v10 }
 0x2fe   :  { %633 = vpow2.f32 %v404_v11 }
 0x305   :  { %v628_v12 = vpop.eup %627 }
 0x306   :  { %v630_v13 = vpop.eup %629  ;;  %v335_v14 = vadd.f32 1.0, %v628_v12  ;;  %v338_v20 = vmul.f32 -0.5, %v628_v12  ;;  %v341_v25 = vand.u32 2147483647, %v628_v12 }
 0x307   :  { %v344_v15 = vadd.f32 1.0, %v630_v13  ;;  %v632_v16 = vpop.eup %631  ;;  %v347_v21 = vmul.f32 -0.5, %v630_v13  ;;  %v350_v28 = vand.u32 2147483647, %v630_v13 }
 0x308   :  { %635 = vlog2.f32 %v335_v14  ;;  %v634_v17 = vpop.eup %633  ;;  %v406_v18 = vadd.f32 1.0, %v632_v16  ;;  %v339_v24 = vadd.f32 1.0, %v338_v20  ;;  %v409_v33 = vmul.f32 -0.5, %v632_v16 }
 0x309   :  { %637 = vlog2.f32 %v344_v15  ;;  %v415_v19 = vadd.f32 1.0, %v634_v17  ;;  %v348_v26 = vadd.f32 1.0, %v347_v21  ;;  %vm342_vm2 = vcmp.lt.f32.partialorder %v341_v25, 0.0004427343 }
 0x30a   :  { %639 = vlog2.f32 %v406_v18  ;;  %v340_v32 = vmul.f32 %v628_v12, %v339_v24  ;;  %v418_v35 = vmul.f32 -0.5, %v634_v17  ;;  %vm351_vm3 = vcmp.lt.f32.partialorder %v350_v28, 0.0004427343 }
 0x30b   :  { %641 = vlog2.f32 %v415_v19  ;;  %v349_v34 = vmul.f32 %v630_v13, %v348_v26  ;;  %v410_v46 = vadd.f32 1.0, %v409_v33  ;;  %v412_v48 = vand.u32 2147483647, %v632_v16 }
 0x30c   :  { %v419_v49 = vadd.f32 1.0, %v418_v35  ;;  %v421_v52 = vand.u32 2147483647, %v634_v17 }
 0x30d   :  { %v411_v54 = vmul.f32 %v632_v16, %v410_v46  ;;  %vm929_vm6 = vcmp.lt.f32.partialorder %v412_v48, 0.0004427343 }
 0x30e   :  { %v420_v60 = vmul.f32 %v634_v17, %v419_v49  ;;  %vm422_vm7 = vcmp.lt.f32.partialorder %v421_v52, 0.0004427343  ;;  %v552_v17 = vld [vmem:[#allocation2] ss:$0 sm:$0xff] }
 0x312   :  { %v636_v22 = vpop.eup %635 }
 0x313   :  { %v638_v23 = vpop.eup %637  ;;  %v337_v27 = vmul.f32 0.6931472, %v636_v22 }
 0x314   :  { %v346_v29 = vmul.f32 0.6931472, %v638_v23  ;;  %v640_v39 = vpop.eup %639 }
 0x315   :  { %v343_v38 = vsel %vm342_vm2, %v340_v32, %v337_v27  ;;  %v642_v42 = vpop.eup %641  ;;  %v408_v51 = vmul.f32 0.6931472, %v640_v39 }
 0x316   :  { %v352_v41 = vsel %vm351_vm3, %v349_v34, %v346_v29  ;;  %v353_v47 = vadd.f32 %v343_v38, %v321_v40  ;;  %v417_v53 = vmul.f32 0.6931472, %v642_v42 }
 0x317   :  { %v354_v50 = vadd.f32 %v352_v41, %v322_v43 }
 0x318   :  { %v355_v56 = vsel %vm323_vm4, %v901_v55, %v353_v47  ;;  %v414_v55 = vsel %vm929_vm6, %v411_v54, %v408_v51  ;;  %v423_v2 = vsel %vm422_vm7, %v420_v60, %v417_v53 }
 0x319   :  { %v356_v61 = vsel %vm324_vm5, %v904_v57, %v354_v50  ;;  %v359_v6 = vmul.f32 %v357_v58, %v355_v56  ;;  %v424_v9 = vadd.f32 %v414_v55, %v392_v0  ;;  %v425_v10 = vadd.f32 %v423_v2, %v393_v7 }
 0x31a   :  { %v360_v8 = vmul.f32 %v358_v62, %v356_v61 }
 0x31b   :  { %v362_v11 = vsel %vm361_vm8, %v359_v6, 0.0  ;;  %v426_v13 = vsel %vm394_vm9, %v912_v1, %v424_v9  ;;  %v427_v14 = vsel %vm395_vm10, %v915_v3, %v425_v10 }
 0x31c   :  { %v365_v12 = vsel %vm361_vm8, %v360_v8, 0.0  ;;  %v429_v15 = vsel %vm428_vm11, %v426_v13, 0.0  ;;  %v432_v16 = vsel %vm428_vm11, %v427_v14, 0.0 }
 0x368   :  { %v459_v63 = vpop.permute.xlu0 %458 }
 0x369   :  { %v457_v4 = vpop.permute.xlu1 %456  ;;  %v465_v5 = vsel %vm361_vm8, %v459_v63, 0.0 }
 0x36a   :  { %466 = vadd.xlane.f32.xlu0 %v465_v5  ;;  %v462_v57 = vsel %vm361_vm8, %v457_v4, 0.0 }
 0x36b   :  { %463 = vadd.xlane.f32.xlu1 %v462_v57 }
 0x36e   :  { %363 = vadd.xlane.f32.xlu0 %v362_v11 }
 0x36f   :  { %366 = vadd.xlane.f32.xlu1 %v365_v12 }
 0x372   :  { %430 = vadd.xlane.f32.xlu0 %v429_v15 }
 0x373   :  { %433 = vadd.xlane.f32.xlu1 %v432_v16 }
 0x388   :  { %284 = vrot.lane.b32.xlu0 %v552_v17, %s727_s5 }
 0x3f7   :  { %v467_v18 = vpop.xlane.xlu0 %466 }
 0x3f8   :  { %643 = vrcp.f32 %v467_v18  ;;  %v464_v19 = vpop.xlane.xlu1 %463 }
 0x3f9   :  { %645 = vrcp.f32 %v464_v19 }
 0x3fb   :  { %v364_v20 = vpop.xlane.xlu0 %363 }
 0x3fc   :  { %647 = vlog2.f32 %v364_v20  ;;  %v367_v1 = vpop.xlane.xlu1 %366 }
 0x3fd   :  { %649 = vlog2.f32 %v367_v1 }
 0x3ff   :  { %v431_v21 = vpop.xlane.xlu0 %430 }
 0x400   :  { %v435_v3 = vmul.f32 %v431_v21, %v880_v37  ;;  %v434_v39 = vpop.xlane.xlu1 %433 }
 0x402   :  { %v644_v22 = vpop.eup %643  ;;  %v437_v38 = vmul.f32 0.2, %v435_v3 }
 0x403   :  { %v646_v23 = vpop.eup %645  ;;  %v471_v24 = vmul.f32 %v644_v22, %v467_v18  ;;  %v285_v25 = vpop.permute.xlu0 %284 }
 0x404   :  { %v470_v26 = vmul.f32 %v646_v23, %v464_v19  ;;  %v287_v27 = vadd.f32 %v285_v25, %v867_v31  ;;  %v288_v28 = vadd.f32 %v865_v30, %v285_v25  ;;  %v436_v30 = vmul.f32 %v434_v39, %v874_v36 }
 0x405   :  { %v473_v29 = vsub.f32 2.0, %v471_v24 }
 0x406   :  { %v648_v32 = vpop.eup %647  ;;  %v472_v33 = vsub.f32 2.0, %v470_v26  ;;  %488 = vrot.lane.b32.xlu0 %v287_v27, %s726_s18  ;;  %490 = vrot.lane.b32.xlu1 %v288_v28, %s726_s18 }
 0x407   :  { %v475_v34 = vmul.f32 %v644_v22, %v473_v29  ;;  %v369_v35 = vmul.f32 0.6931472, %v648_v32  ;;  %v650_v31 = vpop.eup %649 }
 0x408   :  { %v474_v40 = vmul.f32 %v646_v23, %v472_v33 }
 0x409   :  { %v439_v41 = vsub.f32 %v369_v35, %v437_v38  ;;  %v477_v37 = vmul.f32 %v883_v44, %v475_v34 }
 0x40b   :  { %496 = vrot.lane.b32.xlu0 %v439_v41, %s729_s10  ;;  %482 = vrot.lane.b32.xlu1 %v477_v37, %s726_s18 }
 0x40c   :  { %684 = shalt.err (!%p681_p12)
}
 0x40d   :  { %s685_s26 = scalar_lea.hbm %s1006_s13, 256 }
 0x40e   :  { %p686_p13 = scmp.ne.s32.totalorder %s1006_s13, %s685_s26  ;;  %p689_p0 = scmp.lt.u32.totalorder %s685_s26, %s1006_s13 }
 0x410   :  { %p691_p1 = pnand %p689_p0, %p686_p13 }
 0x412   :  { %694 = shalt.err (!%p691_p1)
}
 0x413   :  { %s730_s6 = smov 128   ;;  %s731_s9 = smov 8   ;;  %v371_v36 = vmul.f32 0.6931472, %v650_v31  ;;  %v476_v44 = vmul.f32 %v885_v45, %v474_v40  ;;  %v438_v42 = vmul.f32 0.2, %v436_v30 }
 0x414   :  { %523 = dma.vmem_to_hbm [thread:$0]  %s518_s3, 256, %s1006_s13, [#allocation5], %s730_s6, %s730_s6, %s731_s9   ;;  %vm504_vm12 = vcmask 39936   ;;  %vm507_vm13 = vcmask 48128  }
 0x415   :  { %480 = vrot.lane.b32.xlu1 %v476_v44, %s726_s18  ;;  %v440_v43 = vsub.f32 %v371_v36, %v438_v42  ;;  %s732_s4 = smov [#allocation7]  }
 0x416   :  { %s529_s13 = sshll.u32 %s732_s4, 4  ;;  %s530_s13 = int_to_ptr.vmem [resolvable:$true] %s529_s13 }
 0x417   :  { %s695_s18 = scalar_lea.vmem %s530_s13, 256  ;;  %p700_p3 = scmp.lt.s32.totalorder %s530_s13, %s530_s13 }
 0x418   :  { %p696_p2 = scmp.ne.s32.totalorder %s530_s13, %s695_s18  ;;  %p701_p4 = scmp.lt.s32.totalorder %s695_s18, %s695_s18 }
 0x419   :  { %498 = vrot.lane.b32.xlu1 %v440_v43, %s729_s10 }
 0x41a   :  { %p702_p5 = por %p701_p4, %p700_p3 }
 0x41c   :  { %p703_p6 = pnand %p702_p5, %p696_p2 }
 0x478   :  { %v491_v46 = vpop.permute.xlu1 %490  ;;  %v489_v47 = vpop.permute.xlu0 %488 }
 0x47d   :  { %v483_v48 = vpop.permute.xlu1 %482  ;;  %v497_v50 = vpop.permute.xlu0 %496 }
 0x47e   :  { %v503_v45 = vsel %vm361_vm8, %v483_v48, %v491_v46 }
 0x487   :  { %v481_v49 = vpop.permute.xlu1 %480 }
 0x488   :  { %v502_v51 = vsel %vm361_vm8, %v481_v49, %v489_v47 }
 0x489   :  { %v505_v52 = vsel %vm504_vm12, %v502_v51, %v497_v50 }
 0x48a   :  { %v508_v53 = vsel %vm507_vm13, %v505_v52, 0.0 }
 0x48b   :  { %510 = vst [vmem:[#allocation7] sm:$0xff] %v508_v53  ;;  %v499_v54 = vpop.permute.xlu1 %498 }
 0x48c   :  { %v506_v56 = vsel %vm504_vm12, %v503_v45, %v499_v54 }
 0x48d   :  { %v509_v58 = vsel %vm507_vm13, %v506_v56, 0.0 }
 0x48e   :  { %511 = vst [vmem:[#allocation7 + $0x8] sm:$0xff] %v509_v58 }
 0x48f   :  { %706 = shalt.err (!%p703_p6)
}
 0x490   :  { %s707_s19 = scalar_lea.hbm %s1007_s14, 256 }
 0x491   :  { %p708_p7 = scmp.ne.s32.totalorder %s1007_s14, %s707_s19  ;;  %p711_p8 = scmp.lt.u32.totalorder %s707_s19, %s1007_s14 }
 0x493   :  { %p713_p9 = pnand %p711_p8, %p708_p7 }
 0x495   :  { %716 = shalt.err (!%p713_p9)
}
 0x496   :  { %535 = dma.vmem_to_hbm [thread:$0]  %s530_s13, 256, %s1007_s14, [#allocation8], %s730_s6, %s730_s6, %s731_s9  }
 0x497   :  { %719 = dma.done.wait [#allocation5], 256  }
 0x498   :  { %720 = vsyncadd [#allocation5], 4294967040 }
 0x499   :  { %721 = dma.done.wait [#allocation8], 256  }
 0x49a   :  { %722 = vsyncadd [#allocation8], 4294967040 }
 0x49b   :  { %542 = vsyncpa [#allocation4], 1 }
 0x49c   :  { %543 = vsyncpa [#allocation5], 1 }
 0x49d   :  { %544 = vsyncpa [#allocation8], 1 }

</bundles_post_ra>
